<compile_context>
chip_gen: v6e
topology: v6e:2x2x1
jax: 0.10.0
libtpu: 0.0.40
codegen_flags: <defaults>
</compile_context>

<pallas_src>
import functools

import jax
import jax.numpy as jnp
from jax.experimental import pallas as pl
from jax.experimental.pallas import tpu as pltpu

LANES = 128
SUBLANES = 8


def _tpu_config():
    """(num_shards, max_block_rows, vmem_limit_bytes) per TPU generation."""
    kind = ""
    try:
        kind = (getattr(jax.devices()[0], "device_kind", "") or "").lower()
    except Exception:
        pass
    if "v7" in kind or "tpu7" in kind:
        # 2 TensorCores/chip: shard the leading ("parallel") grid axis.
        # 8192x128 f32 blocks: sum path 16 MiB / elem path 24 MiB of
        # double-buffered inputs -> well inside a 48 MiB scoped limit.
        return 2, 8192, 48 * 1024 * 1024
    if "v6" in kind:
        return 1, 8192, 48 * 1024 * 1024
    # v5e / unknown: stay inside the 16 MiB default scoped-VMEM budget.
    return 1, 2048, None


def _compiler_params(dim_sems, vmem_limit):
    kwargs = dict(dimension_semantics=dim_sems)
    if vmem_limit is not None:
        kwargs["vmem_limit_bytes"] = vmem_limit
    return pltpu.CompilerParams(**kwargs)


def _focal_weight(q, gamma):
    """(1 - p_t) ** gamma; pure VPU multiplies for integer gamma."""
    g = float(gamma)
    if g == int(g) and g >= 0.0:
        gi = int(g)
        if gi == 0:
            return jnp.ones_like(q)
        w = q
        for _ in range(gi - 1):
            w = w * q
        return w
    return q ** g  # non-integer gamma: exp(g*log q) on the EUP


def _pos_loss(p_raw, y_raw, gamma, eps):
    """w * log(p_t + eps) — the NEGATED focal loss (saves one negate/elem)."""
    p = p_raw.astype(jnp.float32)
    y = y_raw.astype(jnp.float32)
    t = p * y
    q = (p + y) - (t + t)          # q = 1 - p_t   (exact for 0/1 labels)
    p_t = 1.0 - q
    return _focal_weight(q, gamma) * jnp.log(p_t + eps)


def _focal_sum_kernel(prob_ref, labels_ref, out_ref, *,
                      gamma, eps, block_rows, inner_steps,
                      last_block, rows_valid, gate_dup, mask_last):
    c = pl.program_id(0)           # shard ("parallel") axis
    i = pl.program_id(1)           # reduction ("arbitrary") axis

    @pl.when(i == 0)
    def _init():
        out_ref[...] = jnp.zeros_like(out_ref)

    block_idx = c * inner_steps + i        # logical (un-clamped) block id

    def accumulate(mask_tail_rows):
        pos = _pos_loss(prob_ref[...], labels_ref[...], gamma, eps)
        if mask_tail_rows:
            # Only the single partial block: rows past the array end hold
            # garbage -> select to 0 (where, not multiply: NaN-safe).
            row = (block_idx * block_rows
                   + jax.lax.broadcasted_iota(jnp.int32, pos.shape, 0))
            pos = jnp.where(row < rows_valid, pos, 0.0)
        # Per-(sublane,lane) partial sums: pure vreg adds on the VPU.  The
        # cross-lane reduction of the (8,128) slab happens once, in the
        # wrapper.  `-=` folds the loss negation into the accumulation.
        out_ref[...] -= pos.reshape(-1, SUBLANES, LANES).sum(axis=0)

    # Scalar pl.when gating replaces the old always-on per-element mask.
    if mask_last and gate_dup:
        @pl.when(block_idx < last_block)
        def _full():
            accumulate(False)

        @pl.when(block_idx == last_block)
        def _partial():
            accumulate(True)
    elif mask_last:
        @pl.when(block_idx != last_block)
        def _full():
            accumulate(False)

        @pl.when(block_idx == last_block)
        def _partial():
            accumulate(True)
    elif gate_dup:
        @pl.when(block_idx <= last_block)
        def _real():
            accumulate(False)
    else:
        accumulate(False)


def _focal_elem_kernel(prob_ref, labels_ref, out_ref, *, gamma, eps):
    pos = _pos_loss(prob_ref[...], labels_ref[...], gamma, eps)
    out_ref[...] = (-pos).astype(out_ref.dtype)


def focal_loss(prob, labels, gamma=2, eps=1e-7, size_average=True):
    """Pallas TPU implementation of FocalLoss.forward.

    size_average=True  -> scalar mean loss (torch.mean semantics).
    size_average=False -> per-element loss tensor, same shape as `prob`.
    Inputs may be f32 or bf16 (bf16 halves HBM read traffic); all math and
    the accumulator stay in f32.
    """
    assert prob.shape == labels.shape
    n = int(prob.size)
    eps = float(eps)
    num_shards, max_block_rows, vmem_limit = _tpu_config()

    prob_flat = prob.reshape(-1)
    labels_flat = labels.reshape(-1)
    rows = n // LANES                      # full 128-lane rows

    # ---------------- size_average=False: per-element output ----------------
    if not size_average:
        pieces = []
        n_main = 0
        if rows >= 1:
            n_main = rows * LANES
            # n % 128 == 0 -> pure (free) reshape; otherwise only the aligned
            # prefix goes through the kernel (no whole-array pad).
            p2d = prob_flat[:n_main].reshape(rows, LANES)
            y2d = labels_flat[:n_main].reshape(rows, LANES)
            block_rows = rows if rows <= max_block_rows else max_block_rows
            num_blocks = pl.cdiv(rows, block_rows)
            out2d = pl.pallas_call(
                functools.partial(_focal_elem_kernel, gamma=gamma, eps=eps),
                out_shape=jax.ShapeDtypeStruct((rows, LANES), jnp.float32),
                grid_spec=pltpu.PrefetchScalarGridSpec(
                    num_scalar_prefetch=0,
                    grid=(num_blocks,),
                    in_specs=[
                        pl.BlockSpec((block_rows, LANES), lambda i: (i, 0)),
                        pl.BlockSpec((block_rows, LANES), lambda i: (i, 0)),
                    ],
                    out_specs=pl.BlockSpec((block_rows, LANES),
                                           lambda i: (i, 0)),
                ),
                compiler_params=_compiler_params(("parallel",), vmem_limit),
            )(p2d, y2d)
            pieces.append(out2d.reshape(-1))
        if n_main < n:
            # < 128-element ragged tail: plain jnp (negligible).
            pieces.append(-_pos_loss(prob_flat[n_main:], labels_flat[n_main:],
                                     gamma, eps))
        out_flat = pieces[0] if len(pieces) == 1 else jnp.concatenate(pieces)
        return out_flat.reshape(prob.shape)

    # ---------------- size_average=True: streaming sum + mean ---------------
    total = jnp.zeros((), jnp.float32)
    n_main = 0
    if rows >= SUBLANES:
        n_main = rows * LANES
        p2d = prob_flat[:n_main].reshape(rows, LANES)
        y2d = labels_flat[:n_main].reshape(rows, LANES)

        block_rows = min(max_block_rows, (rows // SUBLANES) * SUBLANES)
        num_blocks = pl.cdiv(rows, block_rows)
        num_shards = min(num_shards, num_blocks)
        inner_steps = pl.cdiv(num_blocks, num_shards)

        last_block = num_blocks - 1
        gate_dup = (num_shards * inner_steps) != num_blocks   # clamped dup block
        mask_last = (rows % block_rows) != 0                  # partial last block

        if gate_dup:
            def in_index_map(c, i):
                # Clamp so the duplicated trailing block never DMAs out of
                # range; its contribution is skipped by the pl.when gate.
                return (jnp.minimum(c * inner_steps + i, last_block), 0)
        else:
            def in_index_map(c, i):
                return (c * inner_steps + i, 0)

        kernel = functools.partial(
            _focal_sum_kernel,
            gamma=gamma, eps=eps,
            block_rows=block_rows, inner_steps=inner_steps,
            last_block=last_block, rows_valid=rows,
            gate_dup=gate_dup, mask_last=mask_last)

        partials = pl.pallas_call(
            kernel,
            out_shape=jax.ShapeDtypeStruct((num_shards, SUBLANES, LANES),
                                           jnp.float32),
            grid_spec=pltpu.PrefetchScalarGridSpec(
                num_scalar_prefetch=0,
                grid=(num_shards, inner_steps),
                in_specs=[
                    pl.BlockSpec((block_rows, LANES), in_index_map),
                    pl.BlockSpec((block_rows, LANES), in_index_map),
                ],
                # Squeezed leading dim: each shard owns one resident (8,128)
                # accumulator block across the whole "arbitrary" axis.
                out_specs=pl.BlockSpec((None, SUBLANES, LANES),
                                       lambda c, i: (c, 0, 0)),
            ),
            # NOTE: on v7x the leading "parallel" axis is expected to shard
            # across the two TensorCores; if profiling shows it does not,
            # switch that axis to pltpu.CORE_PARALLEL.
            compiler_params=_compiler_params(("parallel", "arbitrary"),
                                             vmem_limit),
        )(p2d, y2d)

        # Final cross-lane reduce of a tiny (shards, 8, 128) slab; fusing it
        # into the kernel epilogue is not worth the extra branch.
        total = total + jnp.sum(partials)

    if n_main < n:
        # Ragged tail (< 1024 elems worst case) in plain jnp: no input pad,
        # exact values, no gamma==0 pad hazard.
        total = total - jnp.sum(_pos_loss(prob_flat[n_main:],
                                          labels_flat[n_main:], gamma, eps))

    return total / n


def focal_loss_ref(prob, labels, gamma=2, eps=1e-7, size_average=True):
    prob = prob.astype(jnp.float32)
    labels = labels.astype(jnp.float32)
    p_t = prob * labels + (1.0 - prob) * (1.0 - labels)
    loss = -((1.0 - p_t) ** gamma) * jnp.log(p_t + eps)
    return jnp.mean(loss) if size_average else loss


if __name__ == "__main__":
    key = jax.random.PRNGKey(0)
    k1, k2, k3, k4 = jax.random.split(key, 4)

    # Small NCHW shape: batch=2, channels=4, spatial=16x16 (n = 2048).
    shape = (2, 4, 16, 16)
    prob = jax.nn.sigmoid(jax.random.normal(k1, shape, jnp.float32))
    labels = (jax.random.uniform(k2, shape) > 0.5).astype(jnp.float32)

    # size_average=True (mean) path.
    out = jax.block_until_ready(focal_loss(prob, labels))
    ref = focal_loss_ref(prob, labels)
    assert jnp.allclose(out, ref, rtol=1e-5, atol=1e-6), (out, ref)

    # size_average=False (per-element) path.
    out_e = jax.block_until_ready(focal_loss(prob, labels, size_average=False))
    ref_e = focal_loss_ref(prob, labels, size_average=False)
    assert out_e.shape == ref_e.shape
    assert jnp.allclose(out_e, ref_e, rtol=1e-5, atol=1e-6)

    # Ragged size: n = 1407 -> 1280-element aligned prefix through the kernel
    # (partial last block -> pl.when-gated row mask) + 127-element jnp tail.
    shape_r = (3, 7, 67)
    prob_r = jax.nn.sigmoid(jax.random.normal(k3, shape_r, jnp.float32))
    labels_r = (jax.random.uniform(k4, shape_r) > 0.5).astype(jnp.float32)
    out_r = jax.block_until_ready(focal_loss(prob_r, labels_r))
    ref_r = focal_loss_ref(prob_r, labels_r)
    assert jnp.allclose(out_r, ref_r, rtol=1e-5, atol=1e-6), (out_r, ref_r)

    out_re = jax.block_until_ready(
        focal_loss(prob_r, labels_r, size_average=False))
    ref_re = focal_loss_ref(prob_r, labels_r, size_average=False)
    assert out_re.shape == ref_re.shape
    assert jnp.allclose(out_re, ref_re, rtol=1e-5, atol=1e-6)

    print("KERNEL_OK")
</pallas_src>

<mosaic_0001>
module attributes {stable_mosaic.version = 11 : i64} {
  func.func @_focal_sum_kernel(%arg0: i32, %arg1: i32, %arg2: memref<16x128xf32, #tpu.memory_space<vmem>>, %arg3: memref<16x128xf32, #tpu.memory_space<vmem>>, %arg4: memref<1x8x128xf32, #tpu.memory_space<vmem>>) attributes {dimension_semantics = [#tpu.dimension_semantics<parallel>, #tpu.dimension_semantics<arbitrary>], iteration_bounds = array<i64: 1, 1>, scalar_prefetch = 0 : i64, scratch_operands = 0 : i64, tpu.core_type = #tpu.core_type<tc>, window_params = [{transform_indices = @transform_0, window_bounds = array<i64: 16, 128>}, {transform_indices = @transform_1, window_bounds = array<i64: 16, 128>}, {transform_indices = @transform_2, window_bounds = array<i64: 1, 8, 128>}]} {
    %c0_i32 = arith.constant 0 : i32
    %0 = arith.cmpi eq, %arg1, %c0_i32 : i32
    %1 = arith.extui %0 : i1 to i32
    %c0_i32_0 = arith.constant 0 : i32
    %2 = arith.cmpi ne, %1, %c0_i32_0 : i32
    scf.if %2 {
      %cst_12 = arith.constant 0.000000e+00 : f32
      %24 = vector.broadcast %cst_12 : f32 to vector<8x128xf32>
      %c0_13 = arith.constant 0 : index
      %c0_14 = arith.constant 0 : index
      %c0_15 = arith.constant 0 : index
      %25 = vector.load %arg4[%c0_13, %c0_14, %c0_15] : memref<1x8x128xf32, #tpu.memory_space<vmem>>, vector<1x8x128xf32>
      %26 = vector.shape_cast %25 : vector<1x8x128xf32> to vector<8x128xf32>
      %27 = vector.shape_cast %24 : vector<8x128xf32> to vector<1x8x128xf32>
      tpu.vector_store %arg4[%c0_13, %c0_14, %c0_15], %27 {strides = array<i32>} : memref<1x8x128xf32, #tpu.memory_space<vmem>>, vector<1x8x128xf32>,
    } else {
    }
    %c0 = arith.constant 0 : index
    %c0_1 = arith.constant 0 : index
    %3 = vector.load %arg2[%c0, %c0_1] : memref<16x128xf32, #tpu.memory_space<vmem>>, vector<16x128xf32>
    %c0_2 = arith.constant 0 : index
    %c0_3 = arith.constant 0 : index
    %4 = vector.load %arg3[%c0_2, %c0_3] : memref<16x128xf32, #tpu.memory_space<vmem>>, vector<16x128xf32>
    %5 = arith.mulf %3, %4 : vector<16x128xf32>
    %6 = arith.addf %3, %4 : vector<16x128xf32>
    %7 = arith.addf %5, %5 : vector<16x128xf32>
    %8 = arith.subf %6, %7 : vector<16x128xf32>
    %cst = arith.constant 1.000000e+00 : f32
    %9 = vector.broadcast %cst : f32 to vector<16x128xf32>
    %10 = arith.subf %9, %8 : vector<16x128xf32>
    %11 = arith.mulf %8, %8 : vector<16x128xf32>
    %cst_4 = arith.constant 1.000000e-07 : f32
    %12 = vector.broadcast %cst_4 : f32 to vector<16x128xf32>
    %13 = arith.addf %10, %12 : vector<16x128xf32>
    %14 = math.log %13 : vector<16x128xf32>
    %15 = arith.mulf %11, %14 : vector<16x128xf32>
    %c0_5 = arith.constant 0 : index
    %c0_6 = arith.constant 0 : index
    %c0_7 = arith.constant 0 : index
    %16 = vector.load %arg4[%c0_5, %c0_6, %c0_7] : memref<1x8x128xf32, #tpu.memory_space<vmem>>, vector<1x8x128xf32>
    %17 = vector.shape_cast %16 : vector<1x8x128xf32> to vector<8x128xf32>
    %18 = vector.shape_cast %15 : vector<16x128xf32> to vector<2x8x128xf32>
    %cst_8 = arith.constant dense<0.000000e+00> : vector<8x128xf32>
    %19 = vector.multi_reduction <add>, %18, %cst_8 [0] : vector<2x8x128xf32> to vector<8x128xf32>
    %20 = arith.subf %17, %19 : vector<8x128xf32>
    %c0_9 = arith.constant 0 : index
    %c0_10 = arith.constant 0 : index
    %c0_11 = arith.constant 0 : index
    %21 = vector.load %arg4[%c0_9, %c0_10, %c0_11] : memref<1x8x128xf32, #tpu.memory_space<vmem>>, vector<1x8x128xf32>
    %22 = vector.shape_cast %21 : vector<1x8x128xf32> to vector<8x128xf32>
    %23 = vector.shape_cast %20 : vector<8x128xf32> to vector<1x8x128xf32>
    tpu.vector_store %arg4[%c0_9, %c0_10, %c0_11], %23 {strides = array<i32>} : memref<1x8x128xf32, #tpu.memory_space<vmem>>, vector<1x8x128xf32>,
    return
  }
  func.func @transform_0(%arg0: i32, %arg1: i32) -> (i32, i32) {
    %c1_i32 = arith.constant 1 : i32
    %0 = arith.muli %arg0, %c1_i32 : i32
    %1 = arith.addi %0, %arg1 : i32
    %c0_i32 = arith.constant 0 : i32
    %c0_i32_0 = arith.constant 0 : i32
    return %1, %c0_i32 : i32, i32
  }
  func.func @transform_1(%arg0: i32, %arg1: i32) -> (i32, i32) {
    %c1_i32 = arith.constant 1 : i32
    %0 = arith.muli %arg0, %c1_i32 : i32
    %1 = arith.addi %0, %arg1 : i32
    %c0_i32 = arith.constant 0 : i32
    %c0_i32_0 = arith.constant 0 : i32
    return %1, %c0_i32 : i32, i32
  }
  func.func @transform_2(%arg0: i32, %arg1: i32) -> (i32, i32, i32) {
    %c0_i32 = arith.constant 0 : i32
    %c0_i32_0 = arith.constant 0 : i32
    %c0_i32_1 = arith.constant 0 : i32
    return %arg0, %c0_i32, %c0_i32_0 : i32, i32, i32
  }
}

</mosaic_0001>

<bundles_post_ra>
// kernel: tpu_custom_call.1
= control target key start
LH: loop header
LB: loop body
LE: loop exit
PB: predicated region body
PF: predicated region fallthrough
CT: control target
= control target key end

     0   :  { %7 = vsyncpa [#allocation3], 0  ;;  %s206_s0 = inlined_call_operand.hbm [shape: f32[16,128], index: 0, kind: input, shape index: {}]   ;;  %s207_s1 = inlined_call_operand.hbm [shape: f32[16,128], index: 1, kind: input, shape index: {}]   ;;  %s208_s2 = inlined_call_operand.hbm [shape: f32[1,8,128], index: 2, kind: output, shape index: {}]  }
   0x1   :  { %8 = vsyncpa [#allocation6], 0 }
   0x2   :  { %9 = vsyncpa [#allocation4], 0  ;;  %s177_s9 = smov [#allocation2]  }
   0x3   :  { %s19_s10 = sshll.u32 %s177_s9, 4  ;;  %s20_s10 = int_to_ptr.vmem [resolvable:$true] %s19_s10 }
   0x4   :  { %s119_s11 = scalar_lea.vmem %s20_s10, 256  ;;  %p124_p1 = scmp.lt.s32.totalorder %s20_s10, %s20_s10 }
   0x5   :  { %p120_p0 = scmp.ne.s32.totalorder %s20_s10, %s119_s11  ;;  %p125_p2 = scmp.lt.s32.totalorder %s119_s11, %s119_s11 }
   0x7   :  { %p126_p3 = por %p125_p2, %p124_p1 }
   0x9   :  { %p127_p4 = pnand %p126_p3, %p120_p0 }
   0xb   :  { %130 = shalt.err (!%p127_p4)
}
   0xc   :  { %s178_s12 = smov 128   ;;  %s179_s13 = smov 8  }
   0xd   :  { %25 = dma.hbm_to_vmem [thread:$0]  %s206_s0, 256, %s20_s10, [#allocation3], %s178_s12, %s178_s12, %s179_s13  }
   0xe   :  { %s180_s16 = smov [#allocation5]  }
   0xf   :  { %s35_s17 = sshll.u32 %s180_s16, 4  ;;  %s36_s17 = int_to_ptr.vmem [resolvable:$true] %s35_s17 }
  0x10   :  { %s139_s18 = scalar_lea.vmem %s36_s17, 256  ;;  %p144_p6 = scmp.lt.s32.totalorder %s36_s17, %s36_s17 }
  0x11   :  { %p140_p5 = scmp.ne.s32.totalorder %s36_s17, %s139_s18  ;;  %p145_p7 = scmp.lt.s32.totalorder %s139_s18, %s139_s18 }
  0x13   :  { %p146_p8 = por %p145_p7, %p144_p6 }
  0x15   :  { %p147_p9 = pnand %p146_p8, %p140_p5 }
  0x17   :  { %150 = shalt.err (!%p147_p9)
}
  0x18   :  { %41 = dma.hbm_to_vmem [thread:$0]  %s207_s1, 256, %s36_s17, [#allocation6], %s178_s12, %s178_s12, %s179_s13  }
  0x19   :  { %171 = dma.done.wait [#allocation3], 256  }
  0x1a   :  { %172 = vsyncadd [#allocation3], 4294967040 }
  0x1b   :  { %173 = dma.done.wait [#allocation6], 256  }
  0x1c   :  { %174 = vsyncadd [#allocation6], 4294967040  ;;  %v57_v0 = vld [vmem:[#allocation2] sm:$0xff]  ;;  %v58_v1 = vld [vmem:[#allocation2 + $0x8] sm:$0xff]  ;;  %s181_s0 = smov [#allocation7]  }
  0x1d   :  { %v59_v2 = vld [vmem:[#allocation5] sm:$0xff]  ;;  %v60_v3 = vld [vmem:[#allocation5 + $0x8] sm:$0xff]  ;;  %s91_s1 = sshll.u32 %s181_s0, 4  ;;  %s92_s1 = int_to_ptr.vmem [resolvable:$true] %s91_s1 }
  0x1e   :  { %v61_v4 = vmul.f32 %v59_v2, %v57_v0  ;;  %v63_v5 = vadd.f32 %v59_v2, %v57_v0  ;;  %v62_v6 = vmul.f32 %v60_v3, %v58_v1  ;;  %v64_v7 = vadd.f32 %v60_v3, %v58_v1  ;;  %s151_s21 = scalar_lea.vmem %s92_s1, 128  ;;  %p156_p11 = scmp.lt.s32.totalorder %s92_s1, %s92_s1 }
  0x1f   :  { %p152_p10 = scmp.ne.s32.totalorder %s92_s1, %s151_s21  ;;  %p157_p12 = scmp.lt.s32.totalorder %s151_s21, %s151_s21 }
  0x20   :  { %v65_v8 = vadd.f32 %v61_v4, %v61_v4  ;;  %v66_v9 = vadd.f32 %v62_v6, %v62_v6 }
  0x21   :  { %p158_p13 = por %p157_p12, %p156_p11 }
  0x22   :  { %v67_v10 = vsub.f32 %v63_v5, %v65_v8  ;;  %v68_v11 = vsub.f32 %v64_v7, %v66_v9 }
  0x23   :  { %p159_p0 = pnand %p158_p13, %p152_p10 }
  0x24   :  { %v69_v12 = vsub.f32 1.0, %v67_v10  ;;  %v70_v13 = vsub.f32 1.0, %v68_v11  ;;  %v71_v16 = vmul.f32 %v67_v10, %v67_v10  ;;  %v72_v18 = vmul.f32 %v68_v11, %v68_v11 }
  0x26   :  { %v73_v14 = vadd.f32 1e-07, %v69_v12  ;;  %v74_v15 = vadd.f32 1e-07, %v70_v13 }
  0x28   :  { %107 = vlog2.f32 %v73_v14 }
  0x29   :  { %109 = vlog2.f32 %v74_v15 }
  0x35   :  { %v108_v17 = vpop.eup %107 }
  0x36   :  { %v110_v19 = vpop.eup %109  ;;  %v76_v20 = vmul.f32 0.6931472, %v108_v17 }
  0x37   :  { %v78_v21 = vmul.f32 0.6931472, %v110_v19 }
  0x38   :  { %v79_v22 = vmul.f32 %v76_v20, %v71_v16 }
  0x39   :  { %v80_v23 = vmul.f32 %v78_v21, %v72_v18 }
  0x3b   :  { %v82_v24 = vadd.f32 %v80_v23, %v79_v22 }
  0x3d   :  { %v83_v25 = vsub.f32 0.0, %v82_v24 }
  0x3f   :  { %84 = vst [vmem:[#allocation7] sm:$0xff] %v83_v25 }
  0x40   :  { %162 = shalt.err (!%p159_p0)
}
  0x41   :  { %94 = dma.vmem_to_hbm [thread:$0]  %s92_s1, 128, %s208_s2, [#allocation4]  }
  0x42   :  { %175 = dma.done.wait [#allocation4], 128  }
  0x43   :  { %176 = vsyncadd [#allocation4], 4294967168 }
  0x44   :  { %98 = vsyncpa [#allocation3], 1 }
  0x45   :  { %99 = vsyncpa [#allocation6], 1 }
  0x46   :  { %100 = vsyncpa [#allocation4], 1 }

</bundles_post_ra>
